<compile_context>
chip_gen: v5e
topology: v5e:2x2
jax: 0.10.0
libtpu: 0.0.40
codegen_flags: <defaults>
</compile_context>

<pallas_src>
import functools

import jax
import jax.numpy as jnp
from jax.experimental import pallas as pl
from jax.experimental.pallas import tpu as pltpu


def _round_up(n, m):
    return ((n + m - 1) // m) * m


def _pick_tile_m(m, target=1024):
    """Row tile: prefer a divisor of m (multiple of 8, <= target, <= m//2 so the
    grid has >= 2 steps).  Fallback: fixed tile + zero-padded rows (masked)."""
    tgt = min(target, max(8, m // 2))
    t = (tgt // 8) * 8
    while t >= 8:
        if m % t == 0:
            return t, m                       # tile, padded row count (== m)
        t -= 8
    t = min(target, _round_up(max(m // 2, 8), 8))
    return t, _round_up(m, t)                 # padded rows are masked in-kernel


# ----------------------------- Pallas kernels -----------------------------

def _power_kernel(x_ref, we_ref, be_ref, ssq_ref, *, tile_m, m_valid, needs_mask):
    # feature tile = patches @ w_enc + b_enc (bf16 MXU, f32 accumulate), reduced
    # immediately to this tile's sum(feature^2); feature is never written to HBM.
    f = jnp.dot(x_ref[...].astype(jnp.bfloat16), we_ref[...],
                preferred_element_type=jnp.float32) + be_ref[...]
    sq = f * f
    if needs_mask:
        row0 = pl.program_id(0) * tile_m
        rows = jax.lax.broadcasted_iota(jnp.int32, sq.shape, 0) + row0
        sq = jnp.where(rows < m_valid, sq, 0.0)
    ssq_ref[...] = jnp.reshape(jnp.sum(sq), (1, 1, 1))


def _fused_kernel(scale_ref, x_ref, n_ref, we_ref, be_ref, wd_ref, bd_ref,
                  recon_ref, sse_ref, *, tile_m, m_valid, needs_mask):
    # Recompute the encoder feature in VMEM, add AWGN, decode, and reduce the
    # 255-scaled squared error against the original patches -- all in one pass.
    x = x_ref[...]
    f = jnp.dot(x.astype(jnp.bfloat16), we_ref[...],
                preferred_element_type=jnp.float32) + be_ref[...]
    noisy = f + n_ref[...] * scale_ref[0, 0]
    r = jnp.dot(noisy.astype(jnp.bfloat16), wd_ref[...],
                preferred_element_type=jnp.float32) + bd_ref[...]
    recon_ref[...] = r                              # unclamped, like PyTorch WITT
    d = (x - jnp.clip(r, 0.0, 1.0)) * 255.0
    sq = d * d
    if needs_mask:
        row0 = pl.program_id(0) * tile_m
        rows = jax.lax.broadcasted_iota(jnp.int32, sq.shape, 0) + row0
        sq = jnp.where(rows < m_valid, sq, 0.0)
    sse_ref[...] = jnp.reshape(jnp.sum(sq), (1, 1, 1))


# ----------------------------- kernel wrappers -----------------------------

def power_call(patches, w_enc, b_enc, tile_m, m_valid):
    Mp, K = patches.shape
    C = w_enc.shape[1]
    G = Mp // tile_m
    kernel = functools.partial(_power_kernel, tile_m=tile_m, m_valid=m_valid,
                               needs_mask=(Mp != m_valid))
    return pl.pallas_call(
        kernel,
        out_shape=jax.ShapeDtypeStruct((G, 1, 1), jnp.float32),
        grid=(G,),
        in_specs=[
            pl.BlockSpec((tile_m, K), lambda i: (i, 0)),   # patches tile (M,48) f32
            pl.BlockSpec((K, C), lambda i: (0, 0)),        # w_enc (48,32) bf16
            pl.BlockSpec((1, C), lambda i: (0, 0)),        # b_enc
        ],
        out_specs=pl.BlockSpec((1, 1, 1), lambda i: (i, 0, 0)),
        compiler_params=pltpu.CompilerParams(
            dimension_semantics=("parallel",)),
    )(patches, w_enc, b_enc)


def fused_call(scale, patches, noise, w_enc, b_enc, w_dec, b_dec, tile_m, m_valid):
    Mp, K = patches.shape
    C = w_enc.shape[1]
    G = Mp // tile_m
    scale_arr = jnp.reshape(scale.astype(jnp.float32), (1, 1))
    kernel = functools.partial(_fused_kernel, tile_m=tile_m, m_valid=m_valid,
                               needs_mask=(Mp != m_valid))
    return pl.pallas_call(
        kernel,
        out_shape=(jax.ShapeDtypeStruct((Mp, K), jnp.float32),
                   jax.ShapeDtypeStruct((G, 1, 1), jnp.float32)),
        grid=(G,),
        in_specs=[
            pl.BlockSpec(memory_space=pltpu.MemorySpace.SMEM),  # scale (1,1) f32
            pl.BlockSpec((tile_m, K), lambda i: (i, 0)),        # patches tile
            pl.BlockSpec((tile_m, C), lambda i: (i, 0)),        # noise tile (valid lanes only)
            pl.BlockSpec((K, C), lambda i: (0, 0)),             # w_enc
            pl.BlockSpec((1, C), lambda i: (0, 0)),             # b_enc
            pl.BlockSpec((C, K), lambda i: (0, 0)),             # w_dec
            pl.BlockSpec((1, K), lambda i: (0, 0)),             # b_dec
        ],
        out_specs=(pl.BlockSpec((tile_m, K), lambda i: (i, 0)),
                   pl.BlockSpec((1, 1, 1), lambda i: (i, 0, 0))),
        compiler_params=pltpu.CompilerParams(
            dimension_semantics=("parallel",)),
    )(scale_arr, patches, noise, w_enc, b_enc, w_dec, b_dec)


# ------------------------------ glue (JAX) ---------------------------------

def patchify(x, p):
    # NCHW -> (B*L, Cin*p*p), channel-major inside a patch (matches Conv2d
    # patch-embedding weight layout (Cout, Cin, p, p)).
    B, C, H, W = x.shape
    x = x.reshape(B, C, H // p, p, W // p, p)
    x = jnp.transpose(x, (0, 2, 4, 1, 3, 5))
    return x.reshape(B * (H // p) * (W // p), C * p * p)


def depatchify(patches, B, C, H, W, p):
    x = patches.reshape(B, H // p, W // p, C, p, p)
    x = jnp.transpose(x, (0, 3, 1, 4, 2, 5))
    return x.reshape(B, C, H, W)


def witt_forward(params, input_image, given_snr, noise_seed):
    """Mirrors WITT.forward(input_image, given_SNR)."""
    B, Cin, H, W = input_image.shape
    p = params["patch"]
    w_enc, b_enc = params["w_enc"], params["b_enc"]
    w_dec, b_dec = params["w_dec"], params["b_dec"]
    K = w_enc.shape[0]                      # Cin * p * p (unpadded)
    C = w_enc.shape[1]                      # feature channels (unpadded)
    M = B * (H // p) * (W // p)
    tile_m, m_pad = _pick_tile_m(M)

    # ---- patch-major input slab (no column padding) ----
    x = input_image.astype(jnp.float32)
    patches = patchify(x, p)                                        # (M, K)
    if m_pad != M:
        patches = jnp.pad(patches, ((0, m_pad - M), (0, 0)))        # masked rows

    # ---- pass 1: encoder recompute -> channel-power scalars only ----
    ssq_parts = power_call(patches, w_enc, b_enc, tile_m, M)        # (G,1,1)
    sumsq = jnp.sum(ssq_parts)

    # ---- CBR ----
    cbr = (M * C) / 2.0 / (B * Cin * H * W)

    # ---- AWGN channel params (pass_channel=True) ----
    # pwr = mean(feature^2) * 2 ; sigma = sqrt(1 / (2 * 10^(snr/10)))
    # noisy = feature + noise * sigma * sqrt(pwr)
    pwr = 2.0 * sumsq / (M * C)
    sigma = jnp.sqrt(1.0 / (2.0 * 10.0 ** (given_snr / 10.0)))
    scale = sigma * jnp.sqrt(pwr)

    # Noise drawn only over the C valid feature lanes (tiling-independent).
    noise = jax.random.normal(jax.random.PRNGKey(noise_seed), (m_pad, C),
                              jnp.float32)

    # ---- pass 2: encoder recompute + AWGN + decoder + 255-scale sq-err ----
    recon_p, sse_parts = fused_call(scale, patches, noise, w_enc, b_enc,
                                    w_dec, b_dec, tile_m, M)        # (Mp,K),(G,1,1)

    # recon_image is returned UNCLAMPED (matches PyTorch WITT); clamp is applied
    # only inside the MSE/distortion computed in-kernel.
    recon_image = depatchify(recon_p[:M], B, Cin, H, W, p)

    # ---- losses (padded rows are masked inside the kernels) ----
    mse_mean = jnp.sum(sse_parts) / float(B * Cin * H * W)
    # Distortion(args) with metric=MSE: identical to mse_mean for same-size images.
    loss_g = mse_mean

    return recon_image, cbr, given_snr, mse_mean, loss_g


# --------------------------------- main -------------------------------------

if __name__ == "__main__":
    key = jax.random.PRNGKey(0)
    k_x, k_we, k_be, k_wd, k_bd, _ = jax.random.split(key, 6)

    # Small, forward-consistent shapes: B=2, 3-channel 16x16 image,
    # downsample=2 (patch 4x4) -> L=16 tokens/image (M=32), feature channels C=32.
    B, Cin, H, W = 2, 3, 16, 16
    downsample = 2
    patch = 2 ** downsample                  # 4
    k_dim = Cin * patch * patch              # 48 (multiple of the bf16 sublane tile)
    c_dim = 32                               # feature channels

    w_enc_v = 0.1 * jax.random.normal(k_we, (k_dim, c_dim), jnp.float32)
    b_enc_v = 0.01 * jax.random.normal(k_be, (1, c_dim), jnp.float32)
    w_dec_v = 0.1 * jax.random.normal(k_wd, (c_dim, k_dim), jnp.float32)
    b_dec_v = 0.01 * jax.random.normal(k_bd, (1, k_dim), jnp.float32)

    params = {
        "patch": patch,
        "w_enc": w_enc_v.astype(jnp.bfloat16),      # (48, 32) bf16, no padding
        "b_enc": b_enc_v,                            # (1, 32)  f32
        "w_dec": w_dec_v.astype(jnp.bfloat16),      # (32, 48) bf16, no padding
        "b_dec": b_dec_v,                            # (1, 48)  f32
    }

    # Input image in [0, 1], NCHW like the PyTorch module expects.
    input_image = jax.random.uniform(k_x, (B, Cin, H, W), jnp.float32)
    given_snr = jnp.float32(10.0)            # deterministic (skips random choice())
    noise_seed = jnp.int32(12345)            # seeds the channel-noise PRNG

    fwd = jax.jit(functools.partial(witt_forward, params))
    recon, cbr, chan_param, mse_mean, loss_g = fwd(input_image, given_snr, noise_seed)

    jax.block_until_ready((recon, mse_mean, loss_g))
    assert recon.shape == (B, Cin, H, W)
    assert recon.dtype == jnp.float32
    assert jnp.isfinite(mse_mean) and jnp.isfinite(loss_g)
    print("KERNEL_OK")
</pallas_src>

<mosaic_0001>
module attributes {stable_mosaic.version = 11 : i64} {
  func.func @_power_kernel(%arg0: i32, %arg1: memref<16x48xf32, #tpu.memory_space<vmem>>, %arg2: memref<48x32xbf16, #tpu.memory_space<vmem>>, %arg3: memref<1x32xf32, #tpu.memory_space<vmem>>, %arg4: memref<1x1x1xf32, #tpu.memory_space<vmem>>) attributes {dimension_semantics = [#tpu.dimension_semantics<parallel>], iteration_bounds = array<i64: 2>, scalar_prefetch = 0 : i64, scratch_operands = 0 : i64, tpu.core_type = #tpu.core_type<tc>, window_params = [{transform_indices = @transform_0, window_bounds = array<i64: 16, 48>}, {pipeline_mode = #tpu.pipeline_mode<synchronous>, transform_indices = @transform_1, window_bounds = array<i64: 48, 32>}, {pipeline_mode = #tpu.pipeline_mode<synchronous>, transform_indices = @transform_2, window_bounds = array<i64: 1, 32>}, {transform_indices = @transform_3, window_bounds = array<i64: 1, 1, 1>}]} {
    %c0 = arith.constant 0 : index
    %c0_0 = arith.constant 0 : index
    %0 = vector.load %arg1[%c0, %c0_0] : memref<16x48xf32, #tpu.memory_space<vmem>>, vector<16x48xf32>
    %1 = arith.truncf %0 : vector<16x48xf32> to vector<16x48xbf16>
    %c0_1 = arith.constant 0 : index
    %c0_2 = arith.constant 0 : index
    %2 = vector.load %arg2[%c0_1, %c0_2] : memref<48x32xbf16, #tpu.memory_space<vmem>>, vector<48x32xbf16>
    %cst = arith.constant dense<0.000000e+00> : vector<16x32xf32>
    %3 = tpu.matmul %1, %2, %cst {dimension_numbers = #tpu.dot_dimension_numbers<[1], [0], [0], [1], [0, 0, 1, 1], [], []>} : vector<16x48xbf16>, vector<48x32xbf16>, vector<16x32xf32> -> vector<16x32xf32>
    %c0_3 = arith.constant 0 : index
    %c0_4 = arith.constant 0 : index
    %4 = vector.load %arg3[%c0_3, %c0_4] : memref<1x32xf32, #tpu.memory_space<vmem>>, vector<1x32xf32>
    %5 = vector.broadcast %4 : vector<1x32xf32> to vector<16x32xf32>
    %6 = arith.addf %3, %5 : vector<16x32xf32>
    %7 = arith.mulf %6, %6 : vector<16x32xf32>
    %8 = vector.shape_cast %7 : vector<16x32xf32> to vector<1x16x32xf32>
    %cst_5 = arith.constant dense<0.000000e+00> : vector<1xf32>
    %9 = vector.multi_reduction <add>, %8, %cst_5 [1, 2] : vector<1x16x32xf32> to vector<1xf32>
    %10 = vector.shape_cast %9 : vector<1xf32> to vector<1x1x1xf32>
    %11 = vector.extract %10[0, 0, 0] : f32 from vector<1x1x1xf32>
    %12 = vector.broadcast %11 : f32 to vector<1x1x1xf32>
    %c0_6 = arith.constant 0 : index
    %c0_7 = arith.constant 0 : index
    %c0_8 = arith.constant 0 : index
    %13 = vector.load %arg4[%c0_6, %c0_7, %c0_8] : memref<1x1x1xf32, #tpu.memory_space<vmem>>, vector<1x1x1xf32>
    tpu.vector_store %arg4[%c0_6, %c0_7, %c0_8], %12 {strides = array<i32>} : memref<1x1x1xf32, #tpu.memory_space<vmem>>, vector<1x1x1xf32>,
    return
  }
  func.func @transform_0(%arg0: i32) -> (i32, i32) {
    %c0_i32 = arith.constant 0 : i32
    %c0_i32_0 = arith.constant 0 : i32
    return %arg0, %c0_i32 : i32, i32
  }
  func.func @transform_1(%arg0: i32) -> (i32, i32) {
    %c0_i32 = arith.constant 0 : i32
    %c0_i32_0 = arith.constant 0 : i32
    %c0_i32_1 = arith.constant 0 : i32
    return %c0_i32, %c0_i32_0 : i32, i32
  }
  func.func @transform_2(%arg0: i32) -> (i32, i32) {
    %c0_i32 = arith.constant 0 : i32
    %c0_i32_0 = arith.constant 0 : i32
    %c0_i32_1 = arith.constant 0 : i32
    return %c0_i32, %c0_i32_0 : i32, i32
  }
  func.func @transform_3(%arg0: i32) -> (i32, i32, i32) {
    %c0_i32 = arith.constant 0 : i32
    %c0_i32_0 = arith.constant 0 : i32
    %c0_i32_1 = arith.constant 0 : i32
    return %arg0, %c0_i32, %c0_i32_0 : i32, i32, i32
  }
}

module attributes {stable_mosaic.version = 11 : i64} {
  func.func @_fused_kernel(%arg0: i32, %arg1: memref<1x1xf32, #tpu.memory_space<smem>>, %arg2: memref<16x48xf32, #tpu.memory_space<vmem>>, %arg3: memref<16x32xf32, #tpu.memory_space<vmem>>, %arg4: memref<48x32xbf16, #tpu.memory_space<vmem>>, %arg5: memref<1x32xf32, #tpu.memory_space<vmem>>, %arg6: memref<32x48xbf16, #tpu.memory_space<vmem>>, %arg7: memref<1x48xf32, #tpu.memory_space<vmem>>, %arg8: memref<16x48xf32, #tpu.memory_space<vmem>>, %arg9: memref<1x1x1xf32, #tpu.memory_space<vmem>>) attributes {dimension_semantics = [#tpu.dimension_semantics<parallel>], iteration_bounds = array<i64: 2>, scalar_prefetch = 0 : i64, scratch_operands = 0 : i64, tpu.core_type = #tpu.core_type<tc>, window_params = [{transform_indices = @transform_0, window_bounds = array<i64: 1, 1>}, {transform_indices = @transform_1, window_bounds = array<i64: 16, 48>}, {transform_indices = @transform_2, window_bounds = array<i64: 16, 32>}, {pipeline_mode = #tpu.pipeline_mode<synchronous>, transform_indices = @transform_3, window_bounds = array<i64: 48, 32>}, {pipeline_mode = #tpu.pipeline_mode<synchronous>, transform_indices = @transform_4, window_bounds = array<i64: 1, 32>}, {pipeline_mode = #tpu.pipeline_mode<synchronous>, transform_indices = @transform_5, window_bounds = array<i64: 32, 48>}, {pipeline_mode = #tpu.pipeline_mode<synchronous>, transform_indices = @transform_6, window_bounds = array<i64: 1, 48>}, {transform_indices = @transform_7, window_bounds = array<i64: 16, 48>}, {transform_indices = @transform_8, window_bounds = array<i64: 1, 1, 1>}]} {
    %c0 = arith.constant 0 : index
    %c0_0 = arith.constant 0 : index
    %0 = vector.load %arg2[%c0, %c0_0] : memref<16x48xf32, #tpu.memory_space<vmem>>, vector<16x48xf32>
    %1 = arith.truncf %0 : vector<16x48xf32> to vector<16x48xbf16>
    %c0_1 = arith.constant 0 : index
    %c0_2 = arith.constant 0 : index
    %2 = vector.load %arg4[%c0_1, %c0_2] : memref<48x32xbf16, #tpu.memory_space<vmem>>, vector<48x32xbf16>
    %cst = arith.constant dense<0.000000e+00> : vector<16x32xf32>
    %3 = tpu.matmul %1, %2, %cst {dimension_numbers = #tpu.dot_dimension_numbers<[1], [0], [0], [1], [0, 0, 1, 1], [], []>} : vector<16x48xbf16>, vector<48x32xbf16>, vector<16x32xf32> -> vector<16x32xf32>
    %c0_3 = arith.constant 0 : index
    %c0_4 = arith.constant 0 : index
    %4 = vector.load %arg5[%c0_3, %c0_4] : memref<1x32xf32, #tpu.memory_space<vmem>>, vector<1x32xf32>
    %5 = vector.broadcast %4 : vector<1x32xf32> to vector<16x32xf32>
    %6 = arith.addf %3, %5 : vector<16x32xf32>
    %c0_5 = arith.constant 0 : index
    %c0_6 = arith.constant 0 : index
    %7 = vector.load %arg3[%c0_5, %c0_6] : memref<16x32xf32, #tpu.memory_space<vmem>>, vector<16x32xf32>
    %c0_7 = arith.constant 0 : index
    %c0_8 = arith.constant 0 : index
    %8 = memref.load %arg1[%c0_7, %c0_8] : memref<1x1xf32, #tpu.memory_space<smem>>
    %9 = vector.broadcast %8 : f32 to vector<16x32xf32>
    %10 = arith.mulf %7, %9 : vector<16x32xf32>
    %11 = arith.addf %6, %10 : vector<16x32xf32>
    %12 = arith.truncf %11 : vector<16x32xf32> to vector<16x32xbf16>
    %c0_9 = arith.constant 0 : index
    %c0_10 = arith.constant 0 : index
    %13 = vector.load %arg6[%c0_9, %c0_10] : memref<32x48xbf16, #tpu.memory_space<vmem>>, vector<32x48xbf16>
    %cst_11 = arith.constant dense<0.000000e+00> : vector<16x48xf32>
    %14 = tpu.matmul %12, %13, %cst_11 {dimension_numbers = #tpu.dot_dimension_numbers<[1], [0], [0], [1], [0, 0, 1, 1], [], []>} : vector<16x32xbf16>, vector<32x48xbf16>, vector<16x48xf32> -> vector<16x48xf32>
    %c0_12 = arith.constant 0 : index
    %c0_13 = arith.constant 0 : index
    %15 = vector.load %arg7[%c0_12, %c0_13] : memref<1x48xf32, #tpu.memory_space<vmem>>, vector<1x48xf32>
    %16 = vector.broadcast %15 : vector<1x48xf32> to vector<16x48xf32>
    %17 = arith.addf %14, %16 : vector<16x48xf32>
    %c0_14 = arith.constant 0 : index
    %c0_15 = arith.constant 0 : index
    %18 = vector.load %arg8[%c0_14, %c0_15] : memref<16x48xf32, #tpu.memory_space<vmem>>, vector<16x48xf32>
    tpu.vector_store %arg8[%c0_14, %c0_15], %17 {strides = array<i32>} : memref<16x48xf32, #tpu.memory_space<vmem>>, vector<16x48xf32>,
    %cst_16 = arith.constant 0.000000e+00 : f32
    %cst_17 = arith.constant 1.000000e+00 : f32
    %19 = vector.broadcast %cst_16 : f32 to vector<16x48xf32>
    %20 = arith.maximumf %19, %17 : vector<16x48xf32>
    %21 = vector.broadcast %cst_17 : f32 to vector<16x48xf32>
    %22 = arith.minimumf %21, %20 : vector<16x48xf32>
    %23 = arith.subf %0, %22 : vector<16x48xf32>
    %cst_18 = arith.constant 2.550000e+02 : f32
    %24 = vector.broadcast %cst_18 : f32 to vector<16x48xf32>
    %25 = arith.mulf %23, %24 : vector<16x48xf32>
    %26 = arith.mulf %25, %25 : vector<16x48xf32>
    %27 = vector.shape_cast %26 : vector<16x48xf32> to vector<1x16x48xf32>
    %cst_19 = arith.constant dense<0.000000e+00> : vector<1xf32>
    %28 = vector.multi_reduction <add>, %27, %cst_19 [1, 2] : vector<1x16x48xf32> to vector<1xf32>
    %29 = vector.shape_cast %28 : vector<1xf32> to vector<1x1x1xf32>
    %30 = vector.extract %29[0, 0, 0] : f32 from vector<1x1x1xf32>
    %31 = vector.broadcast %30 : f32 to vector<1x1x1xf32>
    %c0_20 = arith.constant 0 : index
    %c0_21 = arith.constant 0 : index
    %c0_22 = arith.constant 0 : index
    %32 = vector.load %arg9[%c0_20, %c0_21, %c0_22] : memref<1x1x1xf32, #tpu.memory_space<vmem>>, vector<1x1x1xf32>
    tpu.vector_store %arg9[%c0_20, %c0_21, %c0_22], %31 {strides = array<i32>} : memref<1x1x1xf32, #tpu.memory_space<vmem>>, vector<1x1x1xf32>,
    return
  }
  func.func @transform_0(%arg0: i32) -> (i32, i32) {
    %c0_i32 = arith.constant 0 : i32
    %c0_i32_0 = arith.constant 0 : i32
    %c0_i32_1 = arith.constant 0 : i32
    return %c0_i32, %c0_i32_0 : i32, i32
  }
  func.func @transform_1(%arg0: i32) -> (i32, i32) {
    %c0_i32 = arith.constant 0 : i32
    %c0_i32_0 = arith.constant 0 : i32
    return %arg0, %c0_i32 : i32, i32
  }
  func.func @transform_2(%arg0: i32) -> (i32, i32) {
    %c0_i32 = arith.constant 0 : i32
    %c0_i32_0 = arith.constant 0 : i32
    return %arg0, %c0_i32 : i32, i32
  }
  func.func @transform_3(%arg0: i32) -> (i32, i32) {
    %c0_i32 = arith.constant 0 : i32
    %c0_i32_0 = arith.constant 0 : i32
    %c0_i32_1 = arith.constant 0 : i32
    return %c0_i32, %c0_i32_0 : i32, i32
  }
  func.func @transform_4(%arg0: i32) -> (i32, i32) {
    %c0_i32 = arith.constant 0 : i32
    %c0_i32_0 = arith.constant 0 : i32
    %c0_i32_1 = arith.constant 0 : i32
    return %c0_i32, %c0_i32_0 : i32, i32
  }
  func.func @transform_5(%arg0: i32) -> (i32, i32) {
    %c0_i32 = arith.constant 0 : i32
    %c0_i32_0 = arith.constant 0 : i32
    %c0_i32_1 = arith.constant 0 : i32
    return %c0_i32, %c0_i32_0 : i32, i32
  }
  func.func @transform_6(%arg0: i32) -> (i32, i32) {
    %c0_i32 = arith.constant 0 : i32
    %c0_i32_0 = arith.constant 0 : i32
    %c0_i32_1 = arith.constant 0 : i32
    return %c0_i32, %c0_i32_0 : i32, i32
  }
  func.func @transform_7(%arg0: i32) -> (i32, i32) {
    %c0_i32 = arith.constant 0 : i32
    %c0_i32_0 = arith.constant 0 : i32
    return %arg0, %c0_i32 : i32, i32
  }
  func.func @transform_8(%arg0: i32) -> (i32, i32, i32) {
    %c0_i32 = arith.constant 0 : i32
    %c0_i32_0 = arith.constant 0 : i32
    %c0_i32_1 = arith.constant 0 : i32
    return %arg0, %c0_i32, %c0_i32_0 : i32, i32, i32
  }
}

</mosaic_0001>

<bundles_post_ra>
// kernel: witt_forward.2
= control target key start
LH: loop header
LB: loop body
LE: loop exit
PB: predicated region body
PF: predicated region fallthrough
CT: control target
= control target key end

     0   :  { %s348_s12 = smov 0   ;;  %s382_s0 = inlined_call_operand.vmem [shape: f32[32,48], index: 0, kind: input, shape index: {}]   ;;  %s383_s1 = inlined_call_operand.vmem [shape: bf16[48,32], index: 1, kind: input, shape index: {}]   ;;  %s384_s2 = inlined_call_operand.vmem [shape: f32[1,32], index: 2, kind: input, shape index: {}]   ;;  %s385_s3 = inlined_call_operand.vmem [shape: f32[2,1,1], index: 3, kind: output, shape index: {}]  }
   0x1 LB: > { %s354_s13 = sadd.s32 4294967295, %s326_s12   ;;  %p288_p0 = scmp.ge.s32.totalorder %s326_s12, 1  ;;  %s326_s12 = sphi %s348_s12, %s13_s12  }
   0x2   : > { %p138_p1 = scmp.lt.s32.totalorder %s326_s12, 3 }
   0x4   : > { %p139_p2 = pnand %p288_p0, %p138_p1 }
   0x5   : > { %s289_s16 = sshll.u32 (!%p139_p2), %s354_s13, 1  ;;  %p166_p4 = scmp.lt.s32.totalorder (!%p139_p2), %s354_s13, 1 }
   0x6   : > { %142 = sbr.rel (%p139_p2) target bundleno = 344 (0x158), region = 32  ;;  %p161_p3 = scmp.lt.s32.totalorder (!%p139_p2), %s289_s16, 3 }
   0xb   : > { %v308_v0 = vld [vmem:[%s383_s1 + $0x10] sm:$0xff]  ;;  %v307_v1 = vld [vmem:[%s383_s1 + $0x8] sm:$0xff]  ;;  %s387_s16 = smov (!%p161_p3, %s289_s16), 3  ;;  %v306_v2 = vld [vmem:[%s383_s1] sm:$0xff]  ;;  %vm201_vm0 = vcmask 392192   ;;  %vm221_vm1 = vcmask 261120  }
   0xc   : > { %210 = vmatpush.bf16.msra.mxu0 %v308_v0  ;;  %s290_s19 = sshll.u32 %s387_s16, 3  ;;  %v319_v7 = vld [vmem:[%s384_s2] ss:$0 sm:$0xff]  ;;  %s389_s13 = smov (!%p166_p4, %s354_s13), 1  ;;  %vm235_vm2 = vcmask 0  }
   0xd   : > { %s164_s24 = scalar_lea.vmem %s382_s0, %s290_s19  ;;  %s168_s29 = scalar_lea.vmem %s385_s3, %s389_s13 }
   0xe   : > { %v170_v3 = vld [vmem:[%s164_s24] sm:$0xff]  ;;  %v171_v4 = vld [vmem:[%s164_s24 + $0x8] sm:$0xff] }
   0xf   : > { %v172_v5 = vpack.c.bf16 %v171_v4, %v170_v3 }
  0x10   : > { %211 = vmatpush.bf16.msra.mxu0 %v307_v1 }
  0x14   : > { %212 = vmatpush.bf16.msra.mxu0 %v306_v2 }
  0x17   : > { %303 = vmatmul.msk.bf16.vlgmr.msra.gmra.mxu0 %vm201_vm0, %v172_v5 }
  0x94   : > { %v214_v6 = vpop.f32.mrf.mxu0 }
  0x95   : > { %v215_v8 = vadd.f32 %v319_v7, %v214_v6 }
  0x97   : > { %v219_v10 = vmul.f32 %v215_v8, %v215_v8 }
  0x99   : > { %v222_v13 = vsel %vm221_vm1, %v219_v10, 0.0 }
  0x9c   : > { %v216_v9 = vpop.f32.mrf.mxu0 }
  0x9d   : > { %v217_v11 = vadd.f32 %v319_v7, %v216_v9 }
  0x9f   : > { %v220_v12 = vmul.f32 %v217_v11, %v217_v11 }
  0xa1   : > { %v223_v14 = vsel %vm221_vm1, %v220_v12, 0.0 }
  0xa2   : > { %v224_v15 = vadd.f32 %v223_v14, %v222_v13 }
  0xa4   : > { %225 = vadd.xlane.f32.xlu0 %v224_v15 }
 0x117   : > { %v226_v16 = vpop.xlane.xlu0 %225 }
 0x118   : > { %v227_v17 = vrot.slane %v226_v16, 4 }
 0x11a   : > { %v228_v18 = vadd.f32 %v227_v17, %v226_v16 }
 0x11c   : > { %v229_v19 = vrot.slane %v228_v18, 2 }
 0x11e   : > { %v230_v20 = vadd.f32 %v229_v19, %v228_v18 }
 0x120   : > { %v231_v21 = vrot.slane %v230_v20, 1 }
 0x122   : > { %v232_v22 = vadd.f32 %v231_v21, %v230_v20 }
 0x124   : > { %309 = vpush %v232_v22 }
 0x155   : > { %s310_s30 = spop %309 }
 0x156   : > { %v234_v23 = vstv %s310_s30 }
 0x157   : > { %236 = vst.msk [vmem:[%s168_s29] sm:$0x1] %vm235_vm2, %v234_v23 }
 0x158 PF: > { %s13_s12 = sadd.s32 1, %s326_s12  }
 0x159   : > { %p10_p5 = scmp.ge.s32.totalorder %s13_s12, 4  }
 0x15b   :  { %12 = sbr.rel (!%p10_p5) target bundleno = 1 (0x1), region = 62 }

// kernel: witt_forward.3
= control target key start
LH: loop header
LB: loop body
LE: loop exit
PB: predicated region body
PF: predicated region fallthrough
CT: control target
= control target key end

     0   :  { %s666_s29 = smov 0   ;;  %s725_s0 = inlined_call_operand.<no memory space> [shape: f32[1,1], index: 0, kind: input, shape index: {}]   ;;  %s726_s1 = inlined_call_operand.vmem [shape: f32[32,48], index: 1, kind: input, shape index: {}]   ;;  %s727_s2 = inlined_call_operand.vmem [shape: f32[32,32], index: 2, kind: input, shape index: {}]   ;;  %s728_s3 = inlined_call_operand.vmem [shape: bf16[48,32], index: 3, kind: input, shape index: {}]   ;;  %s729_s4 = inlined_call_operand.vmem [shape: f32[1,32], index: 4, kind: input, shape index: {}]   ;;  %s730_s5 = inlined_call_operand.vmem [shape: bf16[32,48], index: 5, kind: input, shape index: {}]   ;;  %s731_s6 = inlined_call_operand.vmem [shape: f32[1,48], index: 6, kind: input, shape index: {}]   ;;  %s732_s7 = inlined_call_operand.vmem [shape: f32[32,48], index: 7, kind: output, shape index: {0}]   ;;  %s733_s8 = inlined_call_operand.vmem [shape: f32[2,1,1], index: 8, kind: output, shape index: {1}]  }
   0x1   :  { %14 = sst [smem:[#allocation2]] %s725_s0 }
   0x2 LB: > { %s672_s30 = sadd.s32 4294967295, %s616_s29   ;;  %p562_p0 = scmp.ge.s32.totalorder %s616_s29, 1  ;;  %s616_s29 = sphi %s666_s29, %s20_s29  }
   0x3   : > { %p278_p1 = scmp.lt.s32.totalorder %s616_s29, 3 }
   0x5   : > { %p279_p2 = pnand %p562_p0, %p278_p1 }
   0x6   : > { %s563_s0 = sshll.u32 (!%p279_p2), %s672_s30, 1  ;;  %s393_s23 = sld [smem:[#allocation2]] (!%p279_p2) }
   0x7   : > { %282 = sbr.rel (%p279_p2) target bundleno = 493 (0x1ed), region = 48  ;;  %p321_p3 = scmp.lt.s32.totalorder (!%p279_p2), %s563_s0, 3 }
   0x8   : > { %p338_p4 = scmp.lt.s32.totalorder (!%p279_p2), %s672_s30, 1 }
   0xc   : > { %v595_v0 = vld [vmem:[%s728_s3 + $0x10] sm:$0xff]  ;;  %v594_v1 = vld [vmem:[%s728_s3 + $0x8] sm:$0xff]  ;;  %s735_s0 = smov (!%p321_p3, %s563_s0), 3  ;;  %v593_v2 = vld [vmem:[%s728_s3] sm:$0xff]  ;;  %vm373_vm0 = vcmask 392192   ;;  %v394_v11 = vstv %s393_s23  ;;  %vm420_vm1 = vcmask 261120  }
   0xd   : > { %382 = vmatpush.bf16.msra.mxu0 %v595_v0  ;;  %s683_s13 = sshll.u32 %s735_s0, 3  ;;  %v597_v6 = vld [vmem:[%s730_s5 + $0x8] sm:$0xff]  ;;  %v596_v7 = vld [vmem:[%s730_s5] sm:$0xff]  ;;  %s737_s30 = smov (!%p338_p4, %s672_s30), 1  ;;  %vm463_vm2 = vcmask 0  }
   0xe   : > { %s324_s18 = scalar_lea.vmem %s726_s1, %s683_s13  ;;  %430 = vmatpush.bf16.msra.mxu1 %v597_v6  ;;  %s330_s26 = scalar_lea.vmem %s727_s2, %s683_s13  ;;  %v608_v9 = vld [vmem:[%s729_s4] ss:$0 sm:$0xff] }
   0xf   : > { %v342_v3 = vld [vmem:[%s324_s18] sm:$0xff]  ;;  %v343_v4 = vld [vmem:[%s324_s18 + $0x8] sm:$0xff]  ;;  %s336_s12 = scalar_lea.vmem %s732_s7, %s683_s13  ;;  %s340_s15 = scalar_lea.vmem %s733_s8, %s737_s30 }
  0x10   : > { %v344_v5 = vpack.c.bf16 %v343_v4, %v342_v3  ;;  %v391_v10 = vld [vmem:[%s330_s26] sm:$0xff]  ;;  %v392_v12 = vld [vmem:[%s330_s26 + $0x8] sm:$0xff] }
  0x11   : > { %383 = vmatpush.bf16.msra.mxu0 %v594_v1  ;;  %v395_v14 = vmul.f32 %v394_v11, %v391_v10  ;;  %v396_v15 = vmul.f32 %v394_v11, %v392_v12  ;;  %v609_v21 = vld [vmem:[%s731_s6] ss:$0 sm:$0xff] }
  0x12   : > { %431 = vmatpush.bf16.msra.mxu1 %v596_v7 }
  0x15   : > { %384 = vmatpush.bf16.msra.mxu0 %v593_v2 }
  0x18   : > { %581 = vmatmul.msk.bf16.vlgmr.msra.gmra.mxu0 %vm373_vm0, %v344_v5 }
  0x95   : > { %v386_v8 = vpop.f32.mrf.mxu0 }
  0x96   : > { %v387_v13 = vadd.f32 %v608_v9, %v386_v8 }
  0x98   : > { %v397_v18 = vadd.f32 %v395_v14, %v387_v13 }
  0x9d   : > { %v388_v16 = vpop.f32.mrf.mxu0 }
  0x9e   : > { %v389_v17 = vadd.f32 %v608_v9, %v388_v16 }
  0xa0   : > { %v398_v19 = vadd.f32 %v396_v15, %v389_v17 }
  0xa2   : > { %v399_v20 = vpack.c.bf16 %v398_v19, %v397_v18 }
  0xa4   : > { %590 = vmatmul.msk.bf16.vlgmr.msra.gmra.mxu1 %vm420_vm1, %v399_v20 }
 0x121   : > { %v433_v22 = vpop.f32.mrf.mxu1 }
 0x122   : > { %v434_v23 = vadd.f32 %v609_v21, %v433_v22 }
 0x124   : > { %438 = vst.msk [vmem:[%s336_s12] sm:$0xff] %vm373_vm0, %v434_v23  ;;  %v440_v24 = vmax.f32 %v434_v23, 0.0 }
 0x126   : > { %v442_v25 = vmin.f32 %v440_v24, 1.0 }
 0x128   : > { %v444_v28 = vsub.f32 %v342_v3, %v442_v25 }
 0x129   : > { %v435_v26 = vpop.f32.mrf.mxu1 }
 0x12a   : > { %v436_v27 = vadd.f32 %v609_v21, %v435_v26  ;;  %v446_v31 = vmul.f32 255.0, %v444_v28 }
 0x12c   : > { %439 = vst.msk [vmem:[%s336_s12 + $0x8] sm:$0xff] %vm373_vm0, %v436_v27  ;;  %v441_v29 = vmax.f32 %v436_v27, 0.0  ;;  %v448_v34 = vmul.f32 %v446_v31, %v446_v31 }
 0x12e   : > { %v443_v30 = vmin.f32 %v441_v29, 1.0  ;;  %v450_v36 = vsel %vm373_vm0, %v448_v34, 0.0 }
 0x130   : > { %v445_v32 = vsub.f32 %v343_v4, %v443_v30 }
 0x132   : > { %v447_v33 = vmul.f32 255.0, %v445_v32 }
 0x134   : > { %v449_v35 = vmul.f32 %v447_v33, %v447_v33 }
 0x136   : > { %v451_v37 = vsel %vm373_vm0, %v449_v35, 0.0 }
 0x137   : > { %v452_v38 = vadd.f32 %v451_v37, %v450_v36 }
 0x139   : > { %453 = vadd.xlane.f32.xlu0 %v452_v38 }
 0x1ac   : > { %v454_v39 = vpop.xlane.xlu0 %453 }
 0x1ad   : > { %v455_v40 = vrot.slane %v454_v39, 4 }
 0x1af   : > { %v456_v41 = vadd.f32 %v455_v40, %v454_v39 }
 0x1b1   : > { %v457_v42 = vrot.slane %v456_v41, 2 }
 0x1b3   : > { %v458_v43 = vadd.f32 %v457_v42, %v456_v41 }
 0x1b5   : > { %v459_v44 = vrot.slane %v458_v43, 1 }
 0x1b7   : > { %v460_v45 = vadd.f32 %v459_v44, %v458_v43 }
 0x1b9   : > { %598 = vpush %v460_v45 }
 0x1ea   : > { %s599_s16 = spop %598 }
 0x1eb   : > { %v462_v46 = vstv %s599_s16 }
 0x1ec   : > { %464 = vst.msk [vmem:[%s340_s15] sm:$0x1] %vm463_vm2, %v462_v46 }
 0x1ed PF: > { %s20_s29 = sadd.s32 1, %s616_s29  }
 0x1ee   : > { %p17_p5 = scmp.ge.s32.totalorder %s20_s29, 4  }
 0x1f0   :  { %19 = sbr.rel (!%p17_p5) target bundleno = 2 (0x2), region = 93 }

</bundles_post_ra>
